<compile_context>
chip_gen: v6e
topology: v6e:2x2x1
jax: 0.10.0
libtpu: 0.0.40
codegen_flags: <defaults>
</compile_context>

<pallas_src>
import jax
import jax.numpy as jnp
from jax.experimental import pallas as pl
from jax.experimental.pallas import tpu as pltpu


def _round_up(x, m):
    return ((x + m - 1) // m) * m


def _cdiv(a, b):
    return (a + b - 1) // b


def _num_tensorcores():
    # v7x has 2 TensorCores per chip; v5e/v6e have 1.  Chip-conditional grid
    # split: only v7x benefits from >=2 grid steps.
    try:
        kind = jax.devices()[0].device_kind.lower()
    except Exception:
        return 1
    return 2 if ("v7" in kind or "7x" in kind) else 1


def _pack_and_pad(act, max_pack=16):
    """Choose (pack, act_pad) so pack*act_pad is a multiple of 128 (lane-dense
    output slab) without blowing up the block-diagonal weights."""
    if act >= 128:
        return 1, _round_up(act, 128)
    act_pad = act
    while not (128 % act_pad == 0 and 128 // act_pad <= max_pack):
        act_pad += 1
    return 128 // act_pad, act_pad


def pack_action_params(w1, b1, w2, b2, scale, *, max_pack=16):
    """Build the packed / scale-folded parameters ONCE per parameter update.

    w1: (OBS, HID), b1: (HID,), w2: (HID, ACT), b2: (ACT,), scale: () f32.
    Returns a dict consumed by substep_action_forward.
    """
    obs_dim, hid = w1.shape
    act = w2.shape[1]
    assert w2.shape[0] == hid and b1.shape == (hid,) and b2.shape == (act,)

    pack, act_pad = _pack_and_pad(act, max_pack)

    # Fold the learnable scalar into the second layer (in f32, then cast).
    w2s = w2.astype(jnp.float32) * scale
    b2s = b2.astype(jnp.float32) * scale
    if act_pad != act:
        w2s = jnp.pad(w2s, ((0, 0), (0, act_pad - act)))
        b2s = jnp.pad(b2s, (0, act_pad - act))

    # Block-diagonal packed weights: one MXU pass handles `pack` agents and
    # the packed output row is a full multiple of 128 lanes (unmasked vst).
    eye = jnp.eye(pack, dtype=jnp.float32)
    w1_p = jnp.kron(eye, w1.astype(jnp.float32)).astype(jnp.bfloat16)
    w2_p = jnp.kron(eye, w2s).astype(jnp.bfloat16)
    b1_p = jnp.tile(b1.astype(jnp.float32), pack)[None, :]
    b2_p = jnp.tile(b2s, pack)[None, :]

    return dict(w1_p=w1_p, b1_p=b1_p, w2_p=w2_p, b2_p=b2_p,
                pack=pack, obs_dim=obs_dim, hid=hid, act=act, act_pad=act_pad)


def _action_kernel(obs_ref, w1_ref, b1_ref, w2_ref, b2_ref, out_ref):
    # obs_ref : VMEM (TR, PACK*OBS)       f32   packed observation tile
    # w1_ref  : VMEM (PACK*OBS, PACK*HID) bf16  block-diagonal
    # b1_ref  : VMEM (1, PACK*HID)        f32
    # w2_ref  : VMEM (PACK*HID, PACK*ACTP) bf16 block-diagonal, scale folded in
    # b2_ref  : VMEM (1, PACK*ACTP)       f32   scale folded in
    # out_ref : VMEM (TR, PACK*ACTP)            lane-dense (multiple of 128)
    x = obs_ref[...].astype(jnp.bfloat16)              # in-kernel cast (VPU slack)
    h = jnp.dot(x, w1_ref[...], preferred_element_type=jnp.float32)
    h = jnp.maximum(h + b1_ref[...], 0.0)
    a = jnp.dot(h.astype(jnp.bfloat16), w2_ref[...],
                preferred_element_type=jnp.float32)
    out_ref[...] = (a + b2_ref[...]).astype(out_ref.dtype)


def substep_action_forward(observation, params, *, max_tile_rows=1024,
                           out_dtype=jnp.float32, unpad=True):
    """Fused action-network forward using pre-packed params.

    observation: (N, OBS) float32
    params:      output of pack_action_params (built once per param update)
    returns:     (N, ACT) in out_dtype (bf16 recommended when tolerable).
    """
    n, obs_dim = observation.shape
    pack, act, act_pad = params["pack"], params["act"], params["act_pad"]
    hid = params["hid"]
    assert obs_dim == params["obs_dim"]

    k1 = pack * obs_dim
    k2 = pack * hid
    n2 = pack * act_pad                       # always a multiple of 128

    # Pad rows only to the packing unit (pack * 8 agents); the grid handles a
    # partial last block (Pallas masks the out-of-bounds writes).
    unit = pack * 8
    n_pad = _round_up(n, unit)
    obs = observation
    if n_pad != n:
        obs = jnp.pad(obs, ((0, n_pad - n), (0, 0)))
    rows = n_pad // pack                      # multiple of 8
    obs_p = obs.reshape(rows, k1)             # contiguous reshape (free)

    # Tile sizing: as few, as large steps as fit comfortably in VMEM; force a
    # balanced multi-step grid only on v7x (2 TensorCores).
    tile_r = max(8, _round_up(min(max_tile_rows, rows), 8))
    num_tc = _num_tensorcores()
    if num_tc > 1 and rows > 8:
        g = _cdiv(rows, tile_r)
        g = _round_up(max(g, num_tc), num_tc)
        tile_r = max(8, _round_up(_cdiv(rows, g), 8))
    grid = (_cdiv(rows, tile_r),)

    out_p = pl.pallas_call(
        _action_kernel,
        out_shape=jax.ShapeDtypeStruct((rows, n2), out_dtype),
        grid_spec=pltpu.PrefetchScalarGridSpec(
            num_scalar_prefetch=0,
            grid=grid,
            in_specs=[
                pl.BlockSpec((tile_r, k1), lambda i: (i, 0)),   # packed obs (f32)
                pl.BlockSpec((k1, k2), lambda i: (0, 0)),       # W1 (blockdiag)
                pl.BlockSpec((1, k2), lambda i: (0, 0)),        # b1
                pl.BlockSpec((k2, n2), lambda i: (0, 0)),       # W2*scale (blockdiag)
                pl.BlockSpec((1, n2), lambda i: (0, 0)),        # b2*scale
            ],
            out_specs=pl.BlockSpec((tile_r, n2), lambda i: (i, 0)),
        ),
        # ~3 MB double-buffered per step even at tile_r=1024 -> well under
        # every generation's scoped VMEM default, no override needed.
        compiler_params=pltpu.CompilerParams(
            dimension_semantics=("parallel",),
        ),
    )(obs_p, params["w1_p"], params["b1_p"], params["w2_p"], params["b2_p"])

    out = out_p.reshape(n_pad, act_pad)       # contiguous unpack
    if unpad and (n_pad != n or act_pad != act):
        out = out[:n, :act]
    return out


if __name__ == "__main__":
    key = jax.random.PRNGKey(0)
    k_obs, k_w1, k_b1, k_w2, k_b2 = jax.random.split(key, 5)

    # Small, module-consistent shapes: agents x observation features.
    # num_agents intentionally NOT a multiple of the packing unit / tile.
    num_agents, obs_dim, hidden, act_dim = 2000, 32, 32, 16

    observation = jax.random.normal(k_obs, (num_agents, obs_dim), dtype=jnp.float32)
    w1 = jax.random.normal(k_w1, (obs_dim, hidden), dtype=jnp.float32) * 0.1
    b1 = jax.random.normal(k_b1, (hidden,), dtype=jnp.float32) * 0.01
    w2 = jax.random.normal(k_w2, (hidden, act_dim), dtype=jnp.float32) * 0.1
    b2 = jax.random.normal(k_b2, (act_dim,), dtype=jnp.float32) * 0.01
    learnable_scale = jnp.float32(0.5)

    # Packed params built once (cache and reuse across forward calls).
    params = pack_action_params(w1, b1, w2, b2, learnable_scale)

    out = substep_action_forward(observation, params)
    out = jax.block_until_ready(out)
    assert out.shape == (num_agents, act_dim)

    # Reference 1: mirrors the kernel's bf16 input/intermediate rounding and
    # the scale fold into W2/b2.
    obs_b = observation.astype(jnp.bfloat16).astype(jnp.float32)
    w1_b = w1.astype(jnp.bfloat16).astype(jnp.float32)
    w2s_b = (w2 * learnable_scale).astype(jnp.bfloat16).astype(jnp.float32)
    h_ref = jnp.maximum(obs_b @ w1_b + b1, 0.0)
    h_ref = h_ref.astype(jnp.bfloat16).astype(jnp.float32)
    ref_bf16 = h_ref @ w2s_b + b2 * learnable_scale
    assert jnp.allclose(out, ref_bf16, atol=5e-3, rtol=5e-3)

    # Reference 2: pure f32 semantics of the module's forward (looser tol for
    # the bf16 casts).
    ref_f32 = (jnp.maximum(observation @ w1 + b1, 0.0) @ w2 + b2) * learnable_scale
    assert jnp.allclose(out, ref_f32, atol=5e-2, rtol=5e-2)

    print("KERNEL_OK")
</pallas_src>

<mosaic_0001>
module attributes {stable_mosaic.version = 11 : i64} {
  func.func @_action_kernel(%arg0: i32, %arg1: memref<256x256xf32, #tpu.memory_space<vmem>>, %arg2: memref<256x256xbf16, #tpu.memory_space<vmem>>, %arg3: memref<1x256xf32, #tpu.memory_space<vmem>>, %arg4: memref<256x128xbf16, #tpu.memory_space<vmem>>, %arg5: memref<1x128xf32, #tpu.memory_space<vmem>>, %arg6: memref<256x128xf32, #tpu.memory_space<vmem>>) attributes {dimension_semantics = [#tpu.dimension_semantics<parallel>], iteration_bounds = array<i64: 1>, scalar_prefetch = 0 : i64, scratch_operands = 0 : i64, tpu.core_type = #tpu.core_type<tc>, window_params = [{transform_indices = @transform_0, window_bounds = array<i64: 256, 256>}, {pipeline_mode = #tpu.pipeline_mode<synchronous>, transform_indices = @transform_1, window_bounds = array<i64: 256, 256>}, {pipeline_mode = #tpu.pipeline_mode<synchronous>, transform_indices = @transform_2, window_bounds = array<i64: 1, 256>}, {pipeline_mode = #tpu.pipeline_mode<synchronous>, transform_indices = @transform_3, window_bounds = array<i64: 256, 128>}, {pipeline_mode = #tpu.pipeline_mode<synchronous>, transform_indices = @transform_4, window_bounds = array<i64: 1, 128>}, {transform_indices = @transform_5, window_bounds = array<i64: 256, 128>}]} {
    %c0 = arith.constant 0 : index
    %c0_0 = arith.constant 0 : index
    %0 = vector.load %arg1[%c0, %c0_0] : memref<256x256xf32, #tpu.memory_space<vmem>>, vector<256x256xf32>
    %1 = arith.truncf %0 : vector<256x256xf32> to vector<256x256xbf16>
    %c0_1 = arith.constant 0 : index
    %c0_2 = arith.constant 0 : index
    %2 = vector.load %arg2[%c0_1, %c0_2] : memref<256x256xbf16, #tpu.memory_space<vmem>>, vector<256x256xbf16>
    %cst = arith.constant dense<0.000000e+00> : vector<256x256xf32>
    %3 = tpu.matmul %1, %2, %cst {dimension_numbers = #tpu.dot_dimension_numbers<[1], [0], [0], [1], [0, 0, 1, 1], [], []>} : vector<256x256xbf16>, vector<256x256xbf16>, vector<256x256xf32> -> vector<256x256xf32>
    %c0_3 = arith.constant 0 : index
    %c0_4 = arith.constant 0 : index
    %4 = vector.load %arg3[%c0_3, %c0_4] : memref<1x256xf32, #tpu.memory_space<vmem>>, vector<1x256xf32>
    %5 = vector.broadcast %4 : vector<1x256xf32> to vector<256x256xf32>
    %6 = arith.addf %3, %5 : vector<256x256xf32>
    %cst_5 = arith.constant 0.000000e+00 : f32
    %7 = vector.broadcast %cst_5 : f32 to vector<256x256xf32>
    %8 = arith.maximumf %6, %7 : vector<256x256xf32>
    %9 = arith.truncf %8 : vector<256x256xf32> to vector<256x256xbf16>
    %c0_6 = arith.constant 0 : index
    %c0_7 = arith.constant 0 : index
    %10 = vector.load %arg4[%c0_6, %c0_7] : memref<256x128xbf16, #tpu.memory_space<vmem>>, vector<256x128xbf16>
    %cst_8 = arith.constant dense<0.000000e+00> : vector<256x128xf32>
    %11 = tpu.matmul %9, %10, %cst_8 {dimension_numbers = #tpu.dot_dimension_numbers<[1], [0], [0], [1], [0, 0, 1, 1], [], []>} : vector<256x256xbf16>, vector<256x128xbf16>, vector<256x128xf32> -> vector<256x128xf32>
    %c0_9 = arith.constant 0 : index
    %c0_10 = arith.constant 0 : index
    %12 = vector.load %arg5[%c0_9, %c0_10] : memref<1x128xf32, #tpu.memory_space<vmem>>, vector<1x128xf32>
    %13 = vector.broadcast %12 : vector<1x128xf32> to vector<256x128xf32>
    %14 = arith.addf %11, %13 : vector<256x128xf32>
    %c0_11 = arith.constant 0 : index
    %c0_12 = arith.constant 0 : index
    %15 = vector.load %arg6[%c0_11, %c0_12] : memref<256x128xf32, #tpu.memory_space<vmem>>, vector<256x128xf32>
    tpu.vector_store %arg6[%c0_11, %c0_12], %14 {strides = array<i32>} : memref<256x128xf32, #tpu.memory_space<vmem>>, vector<256x128xf32>,
    return
  }
  func.func @transform_0(%arg0: i32) -> (i32, i32) {
    %c0_i32 = arith.constant 0 : i32
    %c0_i32_0 = arith.constant 0 : i32
    return %arg0, %c0_i32 : i32, i32
  }
  func.func @transform_1(%arg0: i32) -> (i32, i32) {
    %c0_i32 = arith.constant 0 : i32
    %c0_i32_0 = arith.constant 0 : i32
    %c0_i32_1 = arith.constant 0 : i32
    return %c0_i32, %c0_i32_0 : i32, i32
  }
  func.func @transform_2(%arg0: i32) -> (i32, i32) {
    %c0_i32 = arith.constant 0 : i32
    %c0_i32_0 = arith.constant 0 : i32
    %c0_i32_1 = arith.constant 0 : i32
    return %c0_i32, %c0_i32_0 : i32, i32
  }
  func.func @transform_3(%arg0: i32) -> (i32, i32) {
    %c0_i32 = arith.constant 0 : i32
    %c0_i32_0 = arith.constant 0 : i32
    %c0_i32_1 = arith.constant 0 : i32
    return %c0_i32, %c0_i32_0 : i32, i32
  }
  func.func @transform_4(%arg0: i32) -> (i32, i32) {
    %c0_i32 = arith.constant 0 : i32
    %c0_i32_0 = arith.constant 0 : i32
    %c0_i32_1 = arith.constant 0 : i32
    return %c0_i32, %c0_i32_0 : i32, i32
  }
  func.func @transform_5(%arg0: i32) -> (i32, i32) {
    %c0_i32 = arith.constant 0 : i32
    %c0_i32_0 = arith.constant 0 : i32
    return %arg0, %c0_i32 : i32, i32
  }
}

</mosaic_0001>

<bundles_post_ra>
// kernel: tpu_custom_call.1
= control target key start
LH: loop header
LB: loop body
LE: loop exit
PB: predicated region body
PF: predicated region fallthrough
CT: control target
= control target key end

     0   :  { %10 = vsyncpa [#allocation3], 0  ;;  %s1485_s0 = inlined_call_operand.hbm [shape: f32[256,256], index: 0, kind: input, shape index: {}]   ;;  %s1486_s1 = inlined_call_operand.hbm [shape: bf16[256,256], index: 1, kind: input, shape index: {}]   ;;  %s1487_s2 = inlined_call_operand.vmem [shape: f32[1,256], index: 2, kind: input, shape index: {}]   ;;  %s1488_s3 = inlined_call_operand.hbm [shape: bf16[256,128], index: 3, kind: input, shape index: {}]   ;;  %s1489_s4 = inlined_call_operand.vmem [shape: f32[1,128], index: 4, kind: input, shape index: {}]   ;;  %s1490_s5 = inlined_call_operand.hbm [shape: f32[256,128], index: 5, kind: output, shape index: {}]  }
   0x1   :  { %11 = vsyncpa [#allocation6], 0 }
   0x2   :  { %12 = vsyncpa [#allocation4], 0  ;;  %s1319_s18 = smov [#allocation5]  }
   0x3   :  { %s30_s19 = sshll.u32 %s1319_s18, 4  ;;  %s31_s19 = int_to_ptr.vmem [resolvable:$true] %s30_s19 }
   0x4   :  { %s1241_s20 = scalar_lea.vmem %s31_s19, 4096  ;;  %p1246_p1 = scmp.lt.s32.totalorder %s31_s19, %s31_s19 }
   0x5   :  { %p1242_p0 = scmp.ne.s32.totalorder %s31_s19, %s1241_s20  ;;  %p1247_p2 = scmp.lt.s32.totalorder %s1241_s20, %s1241_s20 }
   0x7   :  { %p1248_p3 = por %p1247_p2, %p1246_p1 }
   0x9   :  { %p1249_p4 = pnand %p1248_p3, %p1242_p0 }
   0xb   :  { %1252 = shalt.err (!%p1249_p4)
}
   0xc   :  { %s1320_s21 = smov 128   ;;  %s1321_s22 = smov 8  }
   0xd   :  { %36 = dma.hbm_to_vmem [thread:$0]  %s1486_s1, 4096, %s31_s19, [#allocation6], %s1320_s21, %s1320_s21, %s1321_s22  }
   0xe   :  { %s1322_s25 = smov [#allocation2]  }
   0xf   :  { %s18_s26 = sshll.u32 %s1322_s25, 4  ;;  %s19_s26 = int_to_ptr.vmem [resolvable:$true] %s18_s26 }
  0x10   :  { %s1261_s27 = scalar_lea.vmem %s19_s26, 8192  ;;  %p1266_p6 = scmp.lt.s32.totalorder %s19_s26, %s19_s26 }
  0x11   :  { %p1262_p5 = scmp.ne.s32.totalorder %s19_s26, %s1261_s27  ;;  %p1267_p7 = scmp.lt.s32.totalorder %s1261_s27, %s1261_s27 }
  0x13   :  { %p1268_p8 = por %p1267_p7, %p1266_p6 }
  0x15   :  { %p1269_p9 = pnand %p1268_p8, %p1262_p5 }
  0x17   :  { %1272 = shalt.err (!%p1269_p9)
}
  0x18   :  { %s1323_s28 = smov 256   ;;  %s1324_s29 = smov 16  }
  0x19   :  { %24 = dma.hbm_to_vmem [thread:$0]  %s1485_s0, 8192, %s19_s26, [#allocation3], %s1323_s28, %s1323_s28, %s1324_s29  }
  0x1a   :  { %s1325_s7 = smov [#allocation7]  }
  0x1b   :  { %s44_s8 = sshll.u32 %s1325_s7, 4  ;;  %s45_s8 = int_to_ptr.vmem [resolvable:$true] %s44_s8 }
  0x1c   :  { %s1281_s1 = scalar_lea.vmem %s45_s8, 2048  ;;  %p1286_p11 = scmp.lt.s32.totalorder %s45_s8, %s45_s8 }
  0x1d   :  { %p1282_p10 = scmp.ne.s32.totalorder %s45_s8, %s1281_s1  ;;  %p1287_p12 = scmp.lt.s32.totalorder %s1281_s1, %s1281_s1 }
  0x1f   :  { %p1288_p13 = por %p1287_p12, %p1286_p11 }
  0x21   :  { %p1289_p0 = pnand %p1288_p13, %p1282_p10 }
  0x23   :  { %1292 = shalt.err (!%p1289_p0)
}
  0x24   :  { %s1326_s9 = smov 64   ;;  %s1327_s10 = smov 4  }
  0x25   :  { %50 = dma.hbm_to_vmem [thread:$0]  %s1488_s3, 2048, %s45_s8, [#allocation6], %s1326_s9, %s1326_s9, %s1327_s10  }
  0x26   :  { %1313 = dma.done.wait [#allocation3], 8192  }
  0x27   :  { %1314 = vsyncadd [#allocation3], 4294959104 }
  0x28   :  { %1315 = dma.done.wait [#allocation6], 6144  }
  0x29   :  { %1316 = vsyncadd [#allocation6], 4294961152  ;;  %v1169_v0 = vld [vmem:[#allocation5 + $0x74] ss:$8 sps:$4 sm:$0xff]   ;;  %v1171_v1 = vld [vmem:[#allocation5 + $0x70] ss:$8 sps:$4 sm:$0xff]  }
  0x2a   :  { %363 = vmatprep.subr.bf16.mxu0 %v1169_v0  ;;  %v1172_v2 = vld [vmem:[#allocation5 + $0x64] ss:$8 sps:$4 sm:$0xff]   ;;  %v1174_v3 = vld [vmem:[#allocation5 + $0x60] ss:$8 sps:$4 sm:$0xff]   ;;  %v1175_v4 = vld [vmem:[#allocation5 + $0x54] ss:$8 sps:$4 sm:$0xff]  }
  0x2b   :  { %364 = vmatpush1.bf16.msra.mxu0 %v1171_v1  ;;  %v1177_v5 = vld [vmem:[#allocation5 + $0x50] ss:$8 sps:$4 sm:$0xff]   ;;  %v1178_v6 = vld [vmem:[#allocation5 + $0x44] ss:$8 sps:$4 sm:$0xff]   ;;  %v1180_v7 = vld [vmem:[#allocation5 + $0x40] ss:$8 sps:$4 sm:$0xff]  }
  0x2c   :  { %365 = vmatprep.subr.bf16.mxu0 %v1172_v2  ;;  %v1181_v8 = vld [vmem:[#allocation5 + $0x34] ss:$8 sps:$4 sm:$0xff]   ;;  %v1183_v9 = vld [vmem:[#allocation5 + $0x30] ss:$8 sps:$4 sm:$0xff]   ;;  %v1184_v10 = vld [vmem:[#allocation5 + $0x24] ss:$8 sps:$4 sm:$0xff]  }
  0x2d   :  { %v1186_v11 = vld [vmem:[#allocation5 + $0x20] ss:$8 sps:$4 sm:$0xff]   ;;  %v1187_v12 = vld [vmem:[#allocation5 + $0x14] ss:$8 sps:$4 sm:$0xff]   ;;  %v1189_v16 = vld [vmem:[#allocation5 + $0x10] ss:$8 sps:$4 sm:$0xff]  }
  0x2e   :  { %v64_v13 = vld [vmem:[#allocation2 + $0x8] sm:$0xff]  ;;  %v66_v14 = vld [vmem:[#allocation2 + $0x18] sm:$0xff]  ;;  %v1219_v36 = vld [vmem:[#allocation7 + $0x70] sm:$0xff]  }
  0x2f   :  { %366 = vmatpush1.bf16.msra.mxu0 %v1174_v3  ;;  %v128_v15 = vpack.c.bf16 %v66_v14, %v64_v13  ;;  %v1190_v17 = vld [vmem:[#allocation5 + $0x4] ss:$8 sps:$4 sm:$0xff]   ;;  %v1192_v18 = vld [vmem:[#allocation5] ss:$8 sps:$4 sm:$0xff]   ;;  %v1193_v19 = vld [vmem:[#allocation5 + $0xf4] ss:$8 sps:$4 sm:$0xff]  }
  0x30   :  { %367 = vmatprep.subr.bf16.mxu0 %v1175_v4  ;;  %v1195_v20 = vld [vmem:[#allocation5 + $0xf0] ss:$8 sps:$4 sm:$0xff]   ;;  %v1196_v21 = vld [vmem:[#allocation5 + $0xe4] ss:$8 sps:$4 sm:$0xff]   ;;  %v1198_v22 = vld [vmem:[#allocation5 + $0xe0] ss:$8 sps:$4 sm:$0xff]  }
  0x31   :  { %395 = vmatprep.mubr.bf16.mxu0 %v128_v15  ;;  %v1199_v23 = vld [vmem:[#allocation5 + $0xd4] ss:$8 sps:$4 sm:$0xff]   ;;  %v1201_v24 = vld [vmem:[#allocation5 + $0xd0] ss:$8 sps:$4 sm:$0xff]   ;;  %v1202_v25 = vld [vmem:[#allocation5 + $0xc4] ss:$8 sps:$4 sm:$0xff]  }
  0x32   :  { %v1204_v26 = vld [vmem:[#allocation5 + $0xc0] ss:$8 sps:$4 sm:$0xff]   ;;  %v1205_v27 = vld [vmem:[#allocation5 + $0xb4] ss:$8 sps:$4 sm:$0xff]   ;;  %v1207_v28 = vld [vmem:[#allocation5 + $0xb0] ss:$8 sps:$4 sm:$0xff]  }
  0x33   :  { %368 = vmatpush1.bf16.msra.mxu0 %v1177_v5  ;;  %v1208_v29 = vld [vmem:[#allocation5 + $0xa4] ss:$8 sps:$4 sm:$0xff]   ;;  %v1210_v30 = vld [vmem:[#allocation5 + $0xa0] ss:$8 sps:$4 sm:$0xff]   ;;  %v1211_v31 = vld [vmem:[#allocation5 + $0x94] ss:$8 sps:$4 sm:$0xff]  }
  0x34   :  { %369 = vmatprep.subr.bf16.mxu0 %v1178_v6  ;;  %v1213_v32 = vld [vmem:[#allocation5 + $0x90] ss:$8 sps:$4 sm:$0xff]   ;;  %v1214_v33 = vld [vmem:[#allocation5 + $0x84] ss:$8 sps:$4 sm:$0xff]   ;;  %v1216_v37 = vld [vmem:[#allocation5 + $0x80] ss:$8 sps:$4 sm:$0xff]  }
  0x35   :  { %v1217_v34 = vld [vmem:[#allocation7 + $0x78] sm:$0xff]   ;;  %v63_v38 = vld [vmem:[#allocation2] sm:$0xff]  ;;  %v65_v39 = vld [vmem:[#allocation2 + $0x10] sm:$0xff] }
  0x36   :  { %v1218_v35 = vld [vmem:[#allocation7 + $0x38] sm:$0xff]   ;;  %v68_v40 = vld [vmem:[#allocation2 + $0x28] sm:$0xff]  ;;  %1047 = vmatprep.subr.bf16.mxu1 %v1217_v34  ;;  %v1220_v42 = vld [vmem:[#allocation7 + $0x30] sm:$0xff]   ;;  %v127_v43 = vpack.c.bf16 %v65_v39, %v63_v38 }
  0x37   :  { %370 = vmatpush1.bf16.msra.mxu0 %v1180_v7  ;;  %v70_v41 = vld [vmem:[#allocation2 + $0x38] sm:$0xff]  ;;  %1048 = vmatpush3.bf16.msra.mxu1 %v1218_v35  ;;  %v1221_v44 = vld [vmem:[#allocation7 + $0x68] sm:$0xff]   ;;  %v1223_v47 = vld [vmem:[#allocation7 + $0x60] sm:$0xff]  }
  0x38   :  { %371 = vmatprep.subr.bf16.mxu0 %v1181_v8  ;;  %1049 = vmatprep.subr.bf16.mxu1 %v1219_v36  ;;  %v130_v45 = vpack.c.bf16 %v70_v41, %v68_v40  ;;  %v1222_v46 = vld [vmem:[#allocation7 + $0x28] sm:$0xff]   ;;  %v67_v48 = vld [vmem:[#allocation2 + $0x20] sm:$0xff]  ;;  %v69_v49 = vld [vmem:[#allocation2 + $0x30] sm:$0xff] }
  0x39   :  { %v72_v50 = vld [vmem:[#allocation2 + $0x48] sm:$0xff]  ;;  %v74_v51 = vld [vmem:[#allocation2 + $0x58] sm:$0xff]  ;;  %v1224_v52 = vld [vmem:[#allocation7 + $0x20] sm:$0xff]   ;;  %v129_v53 = vpack.c.bf16 %v69_v49, %v67_v48 }
  0x3a   :  { %v1225_v54 = vld [vmem:[#allocation7 + $0x58] sm:$0xff]   ;;  %v132_v55 = vpack.c.bf16 %v74_v51, %v72_v50  ;;  %v71_v57 = vld [vmem:[#allocation2 + $0x40] sm:$0xff]  ;;  %v73_v58 = vld [vmem:[#allocation2 + $0x50] sm:$0xff] }
  0x3b   :  { %372 = vmatpush1.bf16.msra.mxu0 %v1183_v9  ;;  %1050 = vmatpush3.bf16.msra.mxu1 %v1220_v42  ;;  %v1226_v56 = vld [vmem:[#allocation7 + $0x18] sm:$0xff]   ;;  %v76_v59 = vld [vmem:[#allocation2 + $0x68] sm:$0xff]  ;;  %v131_v61 = vpack.c.bf16 %v73_v58, %v71_v57  ;;  %v75_v63 = vld [vmem:[#allocation2 + $0x60] sm:$0xff] }
  0x3c   :  { %373 = vmatprep.subr.bf16.mxu0 %v1184_v10  ;;  %1051 = vmatprep.subr.bf16.mxu1 %v1221_v44  ;;  %v78_v60 = vld [vmem:[#allocation2 + $0x78] sm:$0xff]  ;;  %v77_v0 = vld [vmem:[#allocation2 + $0x70] sm:$0xff]  ;;  %v80_v1 = vld [vmem:[#allocation2 + $0x88] sm:$0xff] }
  0x3d   :  { %v134_v62 = vpack.c.bf16 %v78_v60, %v76_v59  ;;  %v82_v2 = vld [vmem:[#allocation2 + $0x98] sm:$0xff]  ;;  %v133_v3 = vpack.c.bf16 %v77_v0, %v75_v63  ;;  %v79_v5 = vld [vmem:[#allocation2 + $0x80] sm:$0xff]  ;;  %v81_v6 = vld [vmem:[#allocation2 + $0x90] sm:$0xff] }
  0x3e   :  { %v136_v4 = vpack.c.bf16 %v82_v2, %v80_v1  ;;  %v84_v7 = vld [vmem:[#allocation2 + $0xa8] sm:$0xff]  ;;  %v86_v8 = vld [vmem:[#allocation2 + $0xb8] sm:$0xff]  ;;  %v135_v9 = vpack.c.bf16 %v81_v6, %v79_v5  ;;  %v1227_v35 = vld [vmem:[#allocation7 + $0x50] sm:$0xff]  }
  0x3f   :  { %374 = vmatpush1.bf16.msra.mxu0 %v1186_v11  ;;  %1052 = vmatpush3.bf16.msra.mxu1 %v1222_v46  ;;  %v138_v10 = vpack.c.bf16 %v86_v8, %v84_v7  ;;  %v83_v11 = vld [vmem:[#allocation2 + $0xa0] sm:$0xff]  ;;  %v88_v13 = vld [vmem:[#allocation2 + $0xc8] sm:$0xff]  ;;  %v90_v14 = vld [vmem:[#allocation2 + $0xd8] sm:$0xff] }
  0x40   :  { %375 = vmatprep.subr.bf16.mxu0 %v1187_v12  ;;  %1053 = vmatprep.subr.bf16.mxu1 %v1223_v47  ;;  %v85_v12 = vld [vmem:[#allocation2 + $0xb0] sm:$0xff]  ;;  %v99_v36 = vld [vmem:[#allocation2 + $0x120] sm:$0xff]  ;;  %v104_v39 = vld [vmem:[#allocation2 + $0x148] sm:$0xff] }
  0x41   :  { %v137_v15 = vpack.c.bf16 %v85_v12, %v83_v11  ;;  %v1228_v38 = vld [vmem:[#allocation7 + $0x10] sm:$0xff]   ;;  %v106_v40 = vld [vmem:[#allocation2 + $0x158] sm:$0xff]  ;;  %v1229_v42 = vld [vmem:[#allocation7 + $0x48] sm:$0xff]  }
  0x42   :  { %v1230_v44 = vld [vmem:[#allocation7 + $0x8] sm:$0xff]   ;;  %v103_v46 = vld [vmem:[#allocation2 + $0x140] sm:$0xff]  ;;  %v105_v47 = vld [vmem:[#allocation2 + $0x150] sm:$0xff] }
  0x43   :  { %376 = vmatpush1.bf16.msra.mxu0 %v1189_v16  ;;  %1054 = vmatpush3.bf16.msra.mxu1 %v1224_v52  ;;  %v140_v16 = vpack.c.bf16 %v90_v14, %v88_v13  ;;  %v1232_v48 = vld [vmem:[#allocation7] sm:$0xff]   ;;  %v108_v49 = vld [vmem:[#allocation2 + $0x168] sm:$0xff]  ;;  %v110_v50 = vld [vmem:[#allocation2 + $0x178] sm:$0xff]  ;;  %v147_v51 = vpack.c.bf16 %v105_v47, %v103_v46 }
  0x44   :  { %377 = vmatprep.subr.bf16.mxu0 %v1190_v17  ;;  %1055 = vmatprep.subr.bf16.mxu1 %v1225_v54  ;;  %v87_v17 = vld [vmem:[#allocation2 + $0xc0] sm:$0xff]  ;;  %v150_v52 = vpack.c.bf16 %v110_v50, %v108_v49  ;;  %v109_v54 = vld [vmem:[#allocation2 + $0x170] sm:$0xff] }
  0x45   :  { %v111_v59 = vld [vmem:[#allocation2 + $0x180] sm:$0xff]  ;;  %v113_v60 = vld [vmem:[#allocation2 + $0x190] sm:$0xff] }
  0x46   :  { %v151_v63 = vpack.c.bf16 %v113_v60, %v111_v59  ;;  %v115_v1 = vld [vmem:[#allocation2 + $0x1a0] sm:$0xff]  ;;  %v117_v2 = vld [vmem:[#allocation2 + $0x1b0] sm:$0xff] }
  0x47   :  { %378 = vmatpush1.bf16.msra.mxu0 %v1192_v18  ;;  %1056 = vmatpush3.bf16.msra.mxu1 %v1226_v56  ;;  %v89_v18 = vld [vmem:[#allocation2 + $0xd0] sm:$0xff]  ;;  %v114_v56 = vld [vmem:[#allocation2 + $0x198] sm:$0xff]  ;;  %v153_v5 = vpack.c.bf16 %v117_v2, %v115_v1  ;;  %v119_v7 = vld [vmem:[#allocation2 + $0x1c0] sm:$0xff] }
  0x48   :  { %379 = vmatprep.subr.bf16.mxu0 %v1193_v19  ;;  %v92_v19 = vld [vmem:[#allocation2 + $0xe8] sm:$0xff]  ;;  %1057 = vmatprep.subr.bf16.mxu1 %v1227_v35  ;;  %v121_v8 = vld [vmem:[#allocation2 + $0x1d0] sm:$0xff]  ;;  %v123_v13 = vld [vmem:[#allocation2 + $0x1e0] sm:$0xff] }
  0x49   :  { %v155_v11 = vpack.c.bf16 %v121_v8, %v119_v7  ;;  %v125_v14 = vld [vmem:[#allocation2 + $0x1f0] sm:$0xff] }
  0x4b   :  { %380 = vmatpush2.bf16.msra.mxu0 %v1195_v20  ;;  %v94_v20 = vld [vmem:[#allocation2 + $0xf8] sm:$0xff]  ;;  %1058 = vmatpush3.bf16.msra.mxu1 %v1228_v38 }
  0x4c   :  { %381 = vmatprep.subr.bf16.mxu0 %v1196_v21  ;;  %v139_v21 = vpack.c.bf16 %v89_v18, %v87_v17  ;;  %1059 = vmatprep.subr.bf16.mxu1 %v1229_v42 }
  0x4f   :  { %382 = vmatpush2.bf16.msra.mxu0 %v1198_v22  ;;  %v142_v22 = vpack.c.bf16 %v94_v20, %v92_v19  ;;  %1060 = vmatpush3.bf16.msra.mxu1 %v1230_v44  ;;  %v191_v20 = vld [vmem:[%s1487_s2] sm:$0x3] }
  0x50   :  { %383 = vmatprep.subr.bf16.mxu0 %v1199_v23  ;;  %v91_v23 = vld [vmem:[#allocation2 + $0xe0] sm:$0xff] }
  0x53   :  { %384 = vmatpush2.bf16.msra.mxu0 %v1201_v24  ;;  %v93_v24 = vld [vmem:[#allocation2 + $0xf0] sm:$0xff] }
  0x54   :  { %385 = vmatprep.subr.bf16.mxu0 %v1202_v25  ;;  %v96_v25 = vld [vmem:[#allocation2 + $0x108] sm:$0xff] }
  0x57   :  { %386 = vmatpush2.bf16.msra.mxu0 %v1204_v26  ;;  %v98_v26 = vld [vmem:[#allocation2 + $0x118] sm:$0xff] }
  0x58   :  { %387 = vmatprep.subr.bf16.mxu0 %v1205_v27  ;;  %v141_v27 = vpack.c.bf16 %v93_v24, %v91_v23 }
  0x5b   :  { %388 = vmatpush2.bf16.msra.mxu0 %v1207_v28  ;;  %v144_v28 = vpack.c.bf16 %v98_v26, %v96_v25 }
  0x5c   :  { %389 = vmatprep.subr.bf16.mxu0 %v1208_v29  ;;  %v95_v29 = vld [vmem:[#allocation2 + $0x100] sm:$0xff] }
  0x5f   :  { %390 = vmatpush2.bf16.msra.mxu0 %v1210_v30  ;;  %v97_v30 = vld [vmem:[#allocation2 + $0x110] sm:$0xff] }
  0x60   :  { %391 = vmatprep.subr.bf16.mxu0 %v1211_v31  ;;  %v100_v31 = vld [vmem:[#allocation2 + $0x128] sm:$0xff] }
  0x63   :  { %392 = vmatpush2.bf16.msra.mxu0 %v1213_v32  ;;  %v102_v32 = vld [vmem:[#allocation2 + $0x138] sm:$0xff] }
  0x64   :  { %393 = vmatprep.subr.bf16.mxu0 %v1214_v33  ;;  %v143_v33 = vpack.c.bf16 %v97_v30, %v95_v29  ;;  %v146_v34 = vpack.c.bf16 %v102_v32, %v100_v31 }
  0x67   :  { %394 = vmatpush2.bf16.msra.mxu0 %v1216_v37  ;;  %v101_v37 = vld [vmem:[#allocation2 + $0x130] sm:$0xff] }
  0x68   :  { %v145_v41 = vpack.c.bf16 %v101_v37, %v99_v36 }
  0x6a   :  { %396 = vmatmul.mubr.bf16.vlgmr.msra.gmra.mxu0 %v127_v43  ;;  %v148_v43 = vpack.c.bf16 %v106_v40, %v104_v39 }
  0x6b   :  { %405 = vmatprep.mubr.bf16.mxu0 %v130_v45  ;;  %v1231_v45 = vld [vmem:[#allocation7 + $0x40] sm:$0xff]  }
  0x6c   :  { %1061 = vmatprep.subr.bf16.mxu1 %v1231_v45 }
  0x6d   :  { %1062 = vmatpush3.bf16.msra.mxu1 %v1232_v48 }
  0x72   :  { %406 = vmatmul.mubr.bf16.gmra.mxu0 %v129_v53  ;;  %v107_v53 = vld [vmem:[#allocation2 + $0x160] sm:$0xff] }
  0x73   :  { %415 = vmatprep.mubr.bf16.mxu0 %v132_v55  ;;  %v112_v55 = vld [vmem:[#allocation2 + $0x188] sm:$0xff]  ;;  %v149_v57 = vpack.c.bf16 %v109_v54, %v107_v53 }
  0x74   :  { %v152_v58 = vpack.c.bf16 %v114_v56, %v112_v55 }
  0x7a   :  { %416 = vmatmul.mubr.bf16.gmra.mxu0 %v131_v61  ;;  %v116_v61 = vld [vmem:[#allocation2 + $0x1a8] sm:$0xff] }
  0x7b   :  { %425 = vmatprep.mubr.bf16.mxu0 %v134_v62  ;;  %v118_v62 = vld [vmem:[#allocation2 + $0x1b8] sm:$0xff] }
  0x7c   :  { %v154_v0 = vpack.c.bf16 %v118_v62, %v116_v61 }
  0x82   :  { %426 = vmatmul.mubr.bf16.gmra.mxu0 %v133_v3  ;;  %v120_v3 = vld [vmem:[#allocation2 + $0x1c8] sm:$0xff] }
  0x83   :  { %435 = vmatprep.mubr.bf16.mxu0 %v136_v4  ;;  %v122_v4 = vld [vmem:[#allocation2 + $0x1d8] sm:$0xff] }
  0x84   :  { %v156_v6 = vpack.c.bf16 %v122_v4, %v120_v3 }
  0x8a   :  { %436 = vmatmul.mubr.bf16.gmra.mxu0 %v135_v9  ;;  %v124_v9 = vld [vmem:[#allocation2 + $0x1e8] sm:$0xff] }
  0x8b   :  { %445 = vmatprep.mubr.bf16.mxu0 %v138_v10  ;;  %v126_v10 = vld [vmem:[#allocation2 + $0x1f8] sm:$0xff] }
  0x8c   :  { %v158_v12 = vpack.c.bf16 %v126_v10, %v124_v9 }
  0x92   :  { %446 = vmatmul.mubr.bf16.gmra.mxu0 %v137_v15  ;;  %v157_v15 = vpack.c.bf16 %v125_v14, %v123_v13 }
  0x93   :  { %455 = vmatprep.mubr.bf16.mxu0 %v140_v16  ;;  %v193_v16 = vlaneseq }
  0x95   :  { %v194_v17 = vshrl.u32 %v193_v16, 7 }
  0x97   :  { %v199_v18 = vsub.s32 1, %v194_v17  ;;  %v195_v19 = vsub.s32 0, %v194_v17 }
  0x99   :  { %v1376_v23 = vrot.slane %v191_v20, %v195_v19 }
  0x9a   :  { %456 = vmatmul.mubr.bf16.gmra.mxu0 %v139_v21 }
  0x9b   :  { %465 = vmatprep.mubr.bf16.mxu0 %v142_v22  ;;  %v1374_v22 = vrot.slane %v191_v20, %v199_v18 }
  0xa2   :  { %466 = vmatmul.mubr.bf16.gmra.mxu0 %v141_v27 }
  0xa3   :  { %475 = vmatprep.mubr.bf16.mxu0 %v144_v28 }
  0xaa   :  { %476 = vmatmul.mubr.bf16.gmra.mxu0 %v143_v33 }
  0xab   :  { %485 = vmatprep.mubr.bf16.mxu0 %v146_v34 }
  0xb2   :  { %486 = vmatmul.mubr.bf16.gmra.mxu0 %v145_v41 }
  0xb3   :  { %495 = vmatprep.mubr.bf16.mxu0 %v148_v43 }
  0xba   :  { %496 = vmatmul.mubr.bf16.gmra.mxu0 %v147_v51 }
  0xbb   :  { %505 = vmatprep.mubr.bf16.mxu0 %v150_v52 }
  0xc2   :  { %506 = vmatmul.mubr.bf16.gmra.mxu0 %v149_v57 }
  0xc3   :  { %515 = vmatprep.mubr.bf16.mxu0 %v152_v58 }
  0xca   :  { %516 = vmatmul.mubr.bf16.gmra.mxu0 %v151_v63 }
  0xcb   :  { %525 = vmatprep.mubr.bf16.mxu0 %v154_v0 }
  0xd2   :  { %526 = vmatmul.mubr.bf16.gmra.mxu0 %v153_v5 }
  0xd3   :  { %535 = vmatprep.mubr.bf16.mxu0 %v156_v6 }
  0xda   :  { %536 = vmatmul.mubr.bf16.gmra.mxu0 %v155_v11 }
  0xdb   :  { %545 = vmatprep.mubr.bf16.mxu0 %v158_v12 }
  0xe2   :  { %546 = vmatmul.mubr.bf16.gmra.mxu0 %v157_v15 }
 0x12a   :  { %v397_v21 = vpop.f32.mrf.mxu0 }
 0x12b   :  { %v398_v28 = vadd.f32 %v397_v21, %v1376_v23 }
 0x12c   :  { %v399_v24 = vpop.f32.mrf.mxu0 }
 0x12d   :  { %v400_v26 = vadd.f32 %v399_v24, %v1374_v22  ;;  %v556_v35 = vmax.f32 %v398_v28, 0.0 }
 0x12e   :  { %v401_v25 = vpop.f32.mrf.mxu0 }
 0x12f   :  { %v402_v27 = vadd.f32 %v401_v25, %v1376_v23  ;;  %v557_v33 = vmax.f32 %v400_v26, 0.0 }
 0x130   :  { %v403_v29 = vpop.f32.mrf.mxu0 }
 0x131   :  { %v404_v30 = vadd.f32 %v403_v29, %v1374_v22  ;;  %v558_v31 = vmax.f32 %v402_v27, 0.0 }
 0x132   :  { %v407_v32 = vpop.f32.mrf.mxu0 }
 0x133   :  { %v559_v34 = vmax.f32 %v404_v30, 0.0  ;;  %v620_v38 = vpack.c.bf16 %v558_v31, %v556_v35  ;;  %v408_v42 = vadd.f32 %v407_v32, %v1376_v23 }
 0x134   :  { %v409_v36 = vpop.f32.mrf.mxu0 }
 0x135   :  { %v621_v37 = vpack.c.bf16 %v559_v34, %v557_v33  ;;  %v410_v40 = vadd.f32 %v409_v36, %v1374_v22  ;;  %v560_v49 = vmax.f32 %v408_v42, 0.0 }
 0x136   :  { %v411_v39 = vpop.f32.mrf.mxu0 }
 0x137   :  { %v412_v41 = vadd.f32 %v411_v39, %v1376_v23  ;;  %819 = vmatprep.mubr.bf16.mxu1 %v621_v37  ;;  %v561_v47 = vmax.f32 %v410_v40, 0.0 }
 0x138   :  { %v413_v43 = vpop.f32.mrf.mxu0  ;;  %820 = vmatmul.mubr.bf16.vlgmr.msra.gmra.mxu1 %v620_v38 }
 0x139   :  { %v414_v44 = vadd.f32 %v413_v43, %v1374_v22  ;;  %v562_v45 = vmax.f32 %v412_v41, 0.0 }
 0x13a   :  { %v417_v46 = vpop.f32.mrf.mxu0 }
 0x13b   :  { %v563_v48 = vmax.f32 %v414_v44, 0.0  ;;  %v622_v52 = vpack.c.bf16 %v562_v45, %v560_v49  ;;  %v418_v56 = vadd.f32 %v417_v46, %v1376_v23 }
 0x13c   :  { %v419_v50 = vpop.f32.mrf.mxu0 }
 0x13d   :  { %v623_v51 = vpack.c.bf16 %v563_v48, %v561_v47  ;;  %v420_v54 = vadd.f32 %v419_v50, %v1374_v22  ;;  %v564_v63 = vmax.f32 %v418_v56, 0.0 }
 0x13e   :  { %v421_v53 = vpop.f32.mrf.mxu0 }
 0x13f   :  { %v422_v55 = vadd.f32 %v421_v53, %v1376_v23  ;;  %827 = vmatprep.mubr.bf16.mxu1 %v623_v51  ;;  %v565_v61 = vmax.f32 %v420_v54, 0.0 }
 0x140   :  { %v423_v57 = vpop.f32.mrf.mxu0  ;;  %828 = vmatmul.mubr.bf16.gmra.mxu1 %v622_v52 }
 0x141   :  { %v424_v58 = vadd.f32 %v423_v57, %v1374_v22  ;;  %v566_v59 = vmax.f32 %v422_v55, 0.0 }
 0x142   :  { %v427_v60 = vpop.f32.mrf.mxu0 }
 0x143   :  { %v567_v62 = vmax.f32 %v424_v58, 0.0  ;;  %v624_v2 = vpack.c.bf16 %v566_v59, %v564_v63  ;;  %v428_v6 = vadd.f32 %v427_v60, %v1376_v23 }
 0x144   :  { %v429_v0 = vpop.f32.mrf.mxu0 }
 0x145   :  { %v625_v1 = vpack.c.bf16 %v567_v62, %v565_v61  ;;  %v430_v4 = vadd.f32 %v429_v0, %v1374_v22  ;;  %v568_v13 = vmax.f32 %v428_v6, 0.0 }
 0x146   :  { %v431_v3 = vpop.f32.mrf.mxu0 }
 0x147   :  { %v432_v5 = vadd.f32 %v431_v3, %v1376_v23  ;;  %835 = vmatprep.mubr.bf16.mxu1 %v625_v1  ;;  %v569_v11 = vmax.f32 %v430_v4, 0.0 }
 0x148   :  { %v433_v7 = vpop.f32.mrf.mxu0  ;;  %836 = vmatmul.mubr.bf16.gmra.mxu1 %v624_v2 }
 0x149   :  { %v434_v8 = vadd.f32 %v433_v7, %v1374_v22  ;;  %v570_v9 = vmax.f32 %v432_v5, 0.0 }
 0x14a   :  { %v437_v10 = vpop.f32.mrf.mxu0 }
 0x14b   :  { %v571_v12 = vmax.f32 %v434_v8, 0.0  ;;  %v626_v16 = vpack.c.bf16 %v570_v9, %v568_v13  ;;  %v438_v20 = vadd.f32 %v437_v10, %v1376_v23 }
 0x14c   :  { %v439_v14 = vpop.f32.mrf.mxu0 }
 0x14d   :  { %v627_v15 = vpack.c.bf16 %v571_v12, %v569_v11  ;;  %v440_v18 = vadd.f32 %v439_v14, %v1374_v22  ;;  %v572_v29 = vmax.f32 %v438_v20, 0.0 }
 0x14e   :  { %v441_v17 = vpop.f32.mrf.mxu0 }
 0x14f   :  { %v442_v19 = vadd.f32 %v441_v17, %v1376_v23  ;;  %843 = vmatprep.mubr.bf16.mxu1 %v627_v15  ;;  %v573_v27 = vmax.f32 %v440_v18, 0.0 }
 0x150   :  { %v443_v21 = vpop.f32.mrf.mxu0  ;;  %844 = vmatmul.mubr.bf16.gmra.mxu1 %v626_v16 }
 0x151   :  { %v444_v24 = vadd.f32 %v443_v21, %v1374_v22  ;;  %v574_v25 = vmax.f32 %v442_v19, 0.0 }
 0x152   :  { %v447_v26 = vpop.f32.mrf.mxu0 }
 0x153   :  { %v575_v28 = vmax.f32 %v444_v24, 0.0  ;;  %v628_v32 = vpack.c.bf16 %v574_v25, %v572_v29  ;;  %v448_v36 = vadd.f32 %v447_v26, %v1376_v23 }
 0x154   :  { %v449_v30 = vpop.f32.mrf.mxu0 }
 0x155   :  { %v629_v31 = vpack.c.bf16 %v575_v28, %v573_v27  ;;  %v450_v34 = vadd.f32 %v449_v30, %v1374_v22  ;;  %v576_v43 = vmax.f32 %v448_v36, 0.0 }
 0x156   :  { %v451_v33 = vpop.f32.mrf.mxu0 }
 0x157   :  { %v452_v35 = vadd.f32 %v451_v33, %v1376_v23  ;;  %851 = vmatprep.mubr.bf16.mxu1 %v629_v31  ;;  %v577_v41 = vmax.f32 %v450_v34, 0.0 }
 0x158   :  { %v453_v37 = vpop.f32.mrf.mxu0  ;;  %852 = vmatmul.mubr.bf16.gmra.mxu1 %v628_v32 }
 0x159   :  { %v454_v38 = vadd.f32 %v453_v37, %v1374_v22  ;;  %v578_v39 = vmax.f32 %v452_v35, 0.0 }
 0x15a   :  { %v457_v40 = vpop.f32.mrf.mxu0 }
 0x15b   :  { %v579_v42 = vmax.f32 %v454_v38, 0.0  ;;  %v630_v46 = vpack.c.bf16 %v578_v39, %v576_v43  ;;  %v458_v50 = vadd.f32 %v457_v40, %v1376_v23 }
 0x15c   :  { %v459_v44 = vpop.f32.mrf.mxu0 }
 0x15d   :  { %v631_v45 = vpack.c.bf16 %v579_v42, %v577_v41  ;;  %v460_v48 = vadd.f32 %v459_v44, %v1374_v22  ;;  %v580_v57 = vmax.f32 %v458_v50, 0.0 }
 0x15e   :  { %v461_v47 = vpop.f32.mrf.mxu0 }
 0x15f   :  { %v462_v49 = vadd.f32 %v461_v47, %v1376_v23  ;;  %859 = vmatprep.mubr.bf16.mxu1 %v631_v45  ;;  %v581_v55 = vmax.f32 %v460_v48, 0.0 }
 0x160   :  { %v463_v51 = vpop.f32.mrf.mxu0  ;;  %860 = vmatmul.mubr.bf16.gmra.mxu1 %v630_v46 }
 0x161   :  { %v464_v52 = vadd.f32 %v463_v51, %v1374_v22  ;;  %v582_v53 = vmax.f32 %v462_v49, 0.0 }
 0x162   :  { %v467_v54 = vpop.f32.mrf.mxu0 }
 0x163   :  { %v583_v56 = vmax.f32 %v464_v52, 0.0  ;;  %v632_v60 = vpack.c.bf16 %v582_v53, %v580_v57  ;;  %v468_v0 = vadd.f32 %v467_v54, %v1376_v23 }
 0x164   :  { %v469_v58 = vpop.f32.mrf.mxu0 }
 0x165   :  { %v633_v59 = vpack.c.bf16 %v583_v56, %v581_v55  ;;  %v470_v62 = vadd.f32 %v469_v58, %v1374_v22  ;;  %v584_v7 = vmax.f32 %v468_v0, 0.0 }
 0x166   :  { %v471_v61 = vpop.f32.mrf.mxu0 }
 0x167   :  { %v472_v63 = vadd.f32 %v471_v61, %v1376_v23  ;;  %867 = vmatprep.mubr.bf16.mxu1 %v633_v59  ;;  %v585_v5 = vmax.f32 %v470_v62, 0.0 }
 0x168   :  { %v473_v1 = vpop.f32.mrf.mxu0  ;;  %868 = vmatmul.mubr.bf16.gmra.mxu1 %v632_v60 }
 0x169   :  { %v474_v2 = vadd.f32 %v473_v1, %v1374_v22  ;;  %v586_v3 = vmax.f32 %v472_v63, 0.0 }
 0x16a   :  { %v477_v4 = vpop.f32.mrf.mxu0 }
 0x16b   :  { %v587_v6 = vmax.f32 %v474_v2, 0.0  ;;  %v634_v10 = vpack.c.bf16 %v586_v3, %v584_v7  ;;  %v478_v14 = vadd.f32 %v477_v4, %v1376_v23 }
 0x16c   :  { %v479_v8 = vpop.f32.mrf.mxu0 }
 0x16d   :  { %v635_v9 = vpack.c.bf16 %v587_v6, %v585_v5  ;;  %v480_v12 = vadd.f32 %v479_v8, %v1374_v22  ;;  %v588_v21 = vmax.f32 %v478_v14, 0.0 }
 0x16e   :  { %v481_v11 = vpop.f32.mrf.mxu0 }
 0x16f   :  { %v482_v13 = vadd.f32 %v481_v11, %v1376_v23  ;;  %875 = vmatprep.mubr.bf16.mxu1 %v635_v9  ;;  %v589_v19 = vmax.f32 %v480_v12, 0.0 }
 0x170   :  { %v483_v15 = vpop.f32.mrf.mxu0  ;;  %876 = vmatmul.mubr.bf16.gmra.mxu1 %v634_v10 }
 0x171   :  { %v484_v16 = vadd.f32 %v483_v15, %v1374_v22  ;;  %v590_v17 = vmax.f32 %v482_v13, 0.0 }
 0x172   :  { %v487_v18 = vpop.f32.mrf.mxu0 }
 0x173   :  { %v591_v20 = vmax.f32 %v484_v16, 0.0  ;;  %v636_v26 = vpack.c.bf16 %v590_v17, %v588_v21  ;;  %v488_v30 = vadd.f32 %v487_v18, %v1376_v23 }
 0x174   :  { %v489_v24 = vpop.f32.mrf.mxu0 }
 0x175   :  { %v637_v25 = vpack.c.bf16 %v591_v20, %v589_v19  ;;  %v490_v28 = vadd.f32 %v489_v24, %v1374_v22  ;;  %v592_v37 = vmax.f32 %v488_v30, 0.0 }
 0x176   :  { %v491_v27 = vpop.f32.mrf.mxu0 }
 0x177   :  { %v492_v29 = vadd.f32 %v491_v27, %v1376_v23  ;;  %883 = vmatprep.mubr.bf16.mxu1 %v637_v25  ;;  %v593_v35 = vmax.f32 %v490_v28, 0.0 }
 0x178   :  { %v493_v31 = vpop.f32.mrf.mxu0  ;;  %884 = vmatmul.mubr.bf16.gmra.mxu1 %v636_v26 }
 0x179   :  { %v494_v32 = vadd.f32 %v493_v31, %v1374_v22  ;;  %v594_v33 = vmax.f32 %v492_v29, 0.0 }
 0x17a   :  { %v497_v34 = vpop.f32.mrf.mxu0 }
 0x17b   :  { %v595_v36 = vmax.f32 %v494_v32, 0.0  ;;  %v638_v40 = vpack.c.bf16 %v594_v33, %v592_v37  ;;  %v498_v44 = vadd.f32 %v497_v34, %v1376_v23 }
 0x17c   :  { %v499_v38 = vpop.f32.mrf.mxu0 }
 0x17d   :  { %v639_v39 = vpack.c.bf16 %v595_v36, %v593_v35  ;;  %v500_v42 = vadd.f32 %v499_v38, %v1374_v22  ;;  %v596_v51 = vmax.f32 %v498_v44, 0.0 }
 0x17e   :  { %v501_v41 = vpop.f32.mrf.mxu0 }
 0x17f   :  { %v502_v43 = vadd.f32 %v501_v41, %v1376_v23  ;;  %891 = vmatprep.mubr.bf16.mxu1 %v639_v39  ;;  %v597_v49 = vmax.f32 %v500_v42, 0.0 }
 0x180   :  { %v503_v45 = vpop.f32.mrf.mxu0  ;;  %892 = vmatmul.mubr.bf16.gmra.mxu1 %v638_v40 }
 0x181   :  { %v504_v46 = vadd.f32 %v503_v45, %v1374_v22  ;;  %v598_v47 = vmax.f32 %v502_v43, 0.0 }
 0x182   :  { %v507_v48 = vpop.f32.mrf.mxu0 }
 0x183   :  { %v599_v50 = vmax.f32 %v504_v46, 0.0  ;;  %v640_v54 = vpack.c.bf16 %v598_v47, %v596_v51  ;;  %v508_v58 = vadd.f32 %v507_v48, %v1376_v23 }
 0x184   :  { %v509_v52 = vpop.f32.mrf.mxu0 }
 0x185   :  { %v641_v53 = vpack.c.bf16 %v599_v50, %v597_v49  ;;  %v510_v56 = vadd.f32 %v509_v52, %v1374_v22  ;;  %v600_v1 = vmax.f32 %v508_v58, 0.0 }
 0x186   :  { %v511_v55 = vpop.f32.mrf.mxu0 }
 0x187   :  { %v512_v57 = vadd.f32 %v511_v55, %v1376_v23  ;;  %899 = vmatprep.mubr.bf16.mxu1 %v641_v53  ;;  %v601_v63 = vmax.f32 %v510_v56, 0.0 }
 0x188   :  { %v513_v59 = vpop.f32.mrf.mxu0  ;;  %900 = vmatmul.mubr.bf16.gmra.mxu1 %v640_v54 }
 0x189   :  { %v514_v60 = vadd.f32 %v513_v59, %v1374_v22  ;;  %v602_v61 = vmax.f32 %v512_v57, 0.0 }
 0x18a   :  { %v517_v62 = vpop.f32.mrf.mxu0 }
 0x18b   :  { %v603_v0 = vmax.f32 %v514_v60, 0.0  ;;  %v642_v4 = vpack.c.bf16 %v602_v61, %v600_v1  ;;  %v518_v8 = vadd.f32 %v517_v62, %v1376_v23  ;;  %v1445_v62 = vld [vmem:[%s1489_s4] ss:$0 sm:$0xff]  ;;  %s1328_s4 = smov [#allocation8]  }
 0x18c   :  { %v519_v2 = vpop.f32.mrf.mxu0  ;;  %s985_s14 = sshll.u32 %s1328_s4, 4  ;;  %s986_s14 = int_to_ptr.vmem [resolvable:$true] %s985_s14 }
 0x18d   :  { %v643_v3 = vpack.c.bf16 %v603_v0, %v601_v63  ;;  %v520_v6 = vadd.f32 %v519_v2, %v1374_v22  ;;  %v604_v15 = vmax.f32 %v518_v8, 0.0  ;;  %s1293_s15 = scalar_lea.vmem %s986_s14, 4096  ;;  %p1298_p2 = scmp.lt.s32.totalorder %s986_s14, %s986_s14 }
 0x18e   :  { %v521_v5 = vpop.f32.mrf.mxu0  ;;  %p1294_p1 = scmp.ne.s32.totalorder %s986_s14, %s1293_s15  ;;  %p1299_p3 = scmp.lt.s32.totalorder %s1293_s15, %s1293_s15 }
 0x18f   :  { %v522_v7 = vadd.f32 %v521_v5, %v1376_v23  ;;  %907 = vmatprep.mubr.bf16.mxu1 %v643_v3  ;;  %v605_v13 = vmax.f32 %v520_v6, 0.0 }
 0x190   :  { %v523_v9 = vpop.f32.mrf.mxu0  ;;  %908 = vmatmul.mubr.bf16.gmra.mxu1 %v642_v4  ;;  %p1300_p4 = por %p1299_p3, %p1298_p2 }
 0x191   :  { %v524_v10 = vadd.f32 %v523_v9, %v1374_v22  ;;  %v606_v11 = vmax.f32 %v522_v7, 0.0 }
 0x192   :  { %v527_v12 = vpop.f32.mrf.mxu0  ;;  %p1301_p5 = pnand %p1300_p4, %p1294_p1 }
 0x193   :  { %v607_v14 = vmax.f32 %v524_v10, 0.0  ;;  %v644_v18 = vpack.c.bf16 %v606_v11, %v604_v15  ;;  %v528_v24 = vadd.f32 %v527_v12, %v1376_v23 }
 0x194   :  { %v529_v16 = vpop.f32.mrf.mxu0 }
 0x195   :  { %v645_v17 = vpack.c.bf16 %v607_v14, %v605_v13  ;;  %v530_v20 = vadd.f32 %v529_v16, %v1374_v22  ;;  %v608_v31 = vmax.f32 %v528_v24, 0.0 }
 0x196   :  { %v531_v19 = vpop.f32.mrf.mxu0 }
 0x197   :  { %v532_v21 = vadd.f32 %v531_v19, %v1376_v23  ;;  %915 = vmatprep.mubr.bf16.mxu1 %v645_v17  ;;  %v609_v29 = vmax.f32 %v530_v20, 0.0 }
 0x198   :  { %v533_v25 = vpop.f32.mrf.mxu0  ;;  %916 = vmatmul.mubr.bf16.gmra.mxu1 %v644_v18 }
 0x199   :  { %v534_v26 = vadd.f32 %v533_v25, %v1374_v22  ;;  %v610_v27 = vmax.f32 %v532_v21, 0.0 }
 0x19a   :  { %v537_v28 = vpop.f32.mrf.mxu0 }
 0x19b   :  { %v611_v30 = vmax.f32 %v534_v26, 0.0  ;;  %v646_v34 = vpack.c.bf16 %v610_v27, %v608_v31  ;;  %v538_v38 = vadd.f32 %v537_v28, %v1376_v23 }
 0x19c   :  { %v539_v32 = vpop.f32.mrf.mxu0 }
 0x19d   :  { %v647_v33 = vpack.c.bf16 %v611_v30, %v609_v29  ;;  %v540_v36 = vadd.f32 %v539_v32, %v1374_v22  ;;  %v612_v45 = vmax.f32 %v538_v38, 0.0 }
 0x19e   :  { %v541_v35 = vpop.f32.mrf.mxu0 }
 0x19f   :  { %v542_v37 = vadd.f32 %v541_v35, %v1376_v23  ;;  %923 = vmatprep.mubr.bf16.mxu1 %v647_v33  ;;  %v613_v43 = vmax.f32 %v540_v36, 0.0 }
 0x1a0   :  { %v543_v39 = vpop.f32.mrf.mxu0  ;;  %924 = vmatmul.mubr.bf16.gmra.mxu1 %v646_v34 }
 0x1a1   :  { %v544_v40 = vadd.f32 %v543_v39, %v1374_v22  ;;  %v614_v41 = vmax.f32 %v542_v37, 0.0 }
 0x1a2   :  { %v547_v42 = vpop.f32.mrf.mxu0 }
 0x1a3   :  { %v615_v44 = vmax.f32 %v544_v40, 0.0  ;;  %v648_v48 = vpack.c.bf16 %v614_v41, %v612_v45  ;;  %v548_v52 = vadd.f32 %v547_v42, %v1376_v23 }
 0x1a4   :  { %v549_v46 = vpop.f32.mrf.mxu0 }
 0x1a5   :  { %v649_v47 = vpack.c.bf16 %v615_v44, %v613_v43  ;;  %v550_v50 = vadd.f32 %v549_v46, %v1374_v22  ;;  %v616_v58 = vmax.f32 %v548_v52, 0.0 }
 0x1a6   :  { %v551_v49 = vpop.f32.mrf.mxu0 }
 0x1a7   :  { %v552_v51 = vadd.f32 %v551_v49, %v1376_v23  ;;  %931 = vmatprep.mubr.bf16.mxu1 %v649_v47  ;;  %v617_v56 = vmax.f32 %v550_v50, 0.0 }
 0x1a8   :  { %v553_v53 = vpop.f32.mrf.mxu0  ;;  %932 = vmatmul.mubr.bf16.gmra.mxu1 %v648_v48 }
 0x1a9   :  { %v554_v54 = vadd.f32 %v553_v53, %v1374_v22  ;;  %v618_v55 = vmax.f32 %v552_v51, 0.0 }
 0x1ab   :  { %v619_v57 = vmax.f32 %v554_v54, 0.0  ;;  %v650_v60 = vpack.c.bf16 %v618_v55, %v616_v58 }
 0x1ad   :  { %v651_v59 = vpack.c.bf16 %v619_v57, %v617_v56 }
 0x1af   :  { %939 = vmatprep.mubr.bf16.mxu1 %v651_v59 }
 0x1b0   :  { %940 = vmatmul.mubr.bf16.gmra.mxu1 %v650_v60 }
 0x1f8   :  { %v1063_v61 = vpop.f32.mrf.mxu1 }
 0x1fa   :  { %v1064_v63 = vpop.f32.mrf.mxu1 }
 0x1fb   :  { %v1065_v23 = vadd.f32 %v1064_v63, %v1063_v61 }
 0x1fc   :  { %v1066_v0 = vpop.f32.mrf.mxu1 }
 0x1fd   :  { %v822_v1 = vadd.f32 %v1065_v23, %v1445_v62 }
 0x1fe   :  { %v1067_v22 = vpop.f32.mrf.mxu1 }
 0x1ff   :  { %948 = vst [vmem:[#allocation8] sm:$0xff] %v822_v1  ;;  %v1068_v2 = vadd.f32 %v1067_v22, %v1066_v0 }
 0x200   :  { %v1069_v3 = vpop.f32.mrf.mxu1 }
 0x201   :  { %v825_v4 = vadd.f32 %v1068_v2, %v1445_v62 }
 0x202   :  { %v1070_v5 = vpop.f32.mrf.mxu1 }
 0x203   :  { %949 = vst [vmem:[#allocation8 + $0x8] sm:$0xff] %v825_v4  ;;  %v1071_v6 = vadd.f32 %v1070_v5, %v1069_v3 }
 0x204   :  { %v1072_v7 = vpop.f32.mrf.mxu1 }
 0x205   :  { %v830_v8 = vadd.f32 %v1071_v6, %v1445_v62 }
 0x206   :  { %v1073_v9 = vpop.f32.mrf.mxu1 }
 0x207   :  { %950 = vst [vmem:[#allocation8 + $0x10] sm:$0xff] %v830_v8  ;;  %v1074_v10 = vadd.f32 %v1073_v9, %v1072_v7 }
 0x208   :  { %v1075_v11 = vpop.f32.mrf.mxu1 }
 0x209   :  { %v833_v12 = vadd.f32 %v1074_v10, %v1445_v62 }
 0x20a   :  { %v1076_v13 = vpop.f32.mrf.mxu1 }
 0x20b   :  { %951 = vst [vmem:[#allocation8 + $0x18] sm:$0xff] %v833_v12  ;;  %v1077_v14 = vadd.f32 %v1076_v13, %v1075_v11 }
 0x20c   :  { %v1078_v15 = vpop.f32.mrf.mxu1 }
 0x20d   :  { %v838_v16 = vadd.f32 %v1077_v14, %v1445_v62 }
 0x20e   :  { %v1079_v17 = vpop.f32.mrf.mxu1 }
 0x20f   :  { %952 = vst [vmem:[#allocation8 + $0x20] sm:$0xff] %v838_v16  ;;  %v1080_v18 = vadd.f32 %v1079_v17, %v1078_v15 }
 0x210   :  { %v1081_v19 = vpop.f32.mrf.mxu1 }
 0x211   :  { %v841_v20 = vadd.f32 %v1080_v18, %v1445_v62 }
 0x212   :  { %v1082_v21 = vpop.f32.mrf.mxu1 }
 0x213   :  { %953 = vst [vmem:[#allocation8 + $0x28] sm:$0xff] %v841_v20  ;;  %v1083_v24 = vadd.f32 %v1082_v21, %v1081_v19 }
 0x214   :  { %v1084_v25 = vpop.f32.mrf.mxu1 }
 0x215   :  { %v846_v26 = vadd.f32 %v1083_v24, %v1445_v62 }
 0x216   :  { %v1085_v27 = vpop.f32.mrf.mxu1 }
 0x217   :  { %954 = vst [vmem:[#allocation8 + $0x30] sm:$0xff] %v846_v26  ;;  %v1086_v28 = vadd.f32 %v1085_v27, %v1084_v25 }
 0x218   :  { %v1087_v29 = vpop.f32.mrf.mxu1 }
 0x219   :  { %v849_v30 = vadd.f32 %v1086_v28, %v1445_v62 }
 0x21a   :  { %v1088_v31 = vpop.f32.mrf.mxu1 }
 0x21b   :  { %955 = vst [vmem:[#allocation8 + $0x38] sm:$0xff] %v849_v30  ;;  %v1089_v32 = vadd.f32 %v1088_v31, %v1087_v29 }
 0x21c   :  { %v1090_v33 = vpop.f32.mrf.mxu1 }
 0x21d   :  { %v854_v34 = vadd.f32 %v1089_v32, %v1445_v62 }
 0x21e   :  { %v1091_v35 = vpop.f32.mrf.mxu1 }
 0x21f   :  { %956 = vst [vmem:[#allocation8 + $0x40] sm:$0xff] %v854_v34  ;;  %v1092_v36 = vadd.f32 %v1091_v35, %v1090_v33 }
 0x220   :  { %v1093_v37 = vpop.f32.mrf.mxu1 }
 0x221   :  { %v857_v38 = vadd.f32 %v1092_v36, %v1445_v62 }
 0x222   :  { %v1094_v39 = vpop.f32.mrf.mxu1 }
 0x223   :  { %957 = vst [vmem:[#allocation8 + $0x48] sm:$0xff] %v857_v38  ;;  %v1095_v40 = vadd.f32 %v1094_v39, %v1093_v37 }
 0x224   :  { %v1096_v41 = vpop.f32.mrf.mxu1 }
 0x225   :  { %v862_v42 = vadd.f32 %v1095_v40, %v1445_v62 }
 0x226   :  { %v1097_v43 = vpop.f32.mrf.mxu1 }
 0x227   :  { %958 = vst [vmem:[#allocation8 + $0x50] sm:$0xff] %v862_v42  ;;  %v1098_v44 = vadd.f32 %v1097_v43, %v1096_v41 }
 0x228   :  { %v1099_v45 = vpop.f32.mrf.mxu1 }
 0x229   :  { %v865_v46 = vadd.f32 %v1098_v44, %v1445_v62 }
 0x22a   :  { %v1100_v47 = vpop.f32.mrf.mxu1 }
 0x22b   :  { %959 = vst [vmem:[#allocation8 + $0x58] sm:$0xff] %v865_v46  ;;  %v1101_v48 = vadd.f32 %v1100_v47, %v1099_v45 }
 0x22c   :  { %v1102_v49 = vpop.f32.mrf.mxu1 }
 0x22d   :  { %v870_v50 = vadd.f32 %v1101_v48, %v1445_v62 }
 0x22e   :  { %v1103_v51 = vpop.f32.mrf.mxu1 }
 0x22f   :  { %960 = vst [vmem:[#allocation8 + $0x60] sm:$0xff] %v870_v50  ;;  %v1104_v52 = vadd.f32 %v1103_v51, %v1102_v49 }
 0x230   :  { %v1105_v53 = vpop.f32.mrf.mxu1 }
 0x231   :  { %v873_v54 = vadd.f32 %v1104_v52, %v1445_v62 }
 0x232   :  { %v1106_v55 = vpop.f32.mrf.mxu1 }
 0x233   :  { %961 = vst [vmem:[#allocation8 + $0x68] sm:$0xff] %v873_v54  ;;  %v1107_v56 = vadd.f32 %v1106_v55, %v1105_v53 }
 0x234   :  { %v1108_v57 = vpop.f32.mrf.mxu1 }
 0x235   :  { %v878_v58 = vadd.f32 %v1107_v56, %v1445_v62 }
 0x236   :  { %v1109_v59 = vpop.f32.mrf.mxu1 }
 0x237   :  { %962 = vst [vmem:[#allocation8 + $0x70] sm:$0xff] %v878_v58  ;;  %v1110_v60 = vadd.f32 %v1109_v59, %v1108_v57 }
 0x238   :  { %v1111_v61 = vpop.f32.mrf.mxu1 }
 0x239   :  { %v881_v63 = vadd.f32 %v1110_v60, %v1445_v62 }
 0x23a   :  { %v1112_v23 = vpop.f32.mrf.mxu1 }
 0x23b   :  { %963 = vst [vmem:[#allocation8 + $0x78] sm:$0xff] %v881_v63  ;;  %v1113_v0 = vadd.f32 %v1112_v23, %v1111_v61 }
 0x23c   :  { %v1114_v1 = vpop.f32.mrf.mxu1 }
 0x23d   :  { %v886_v22 = vadd.f32 %v1113_v0, %v1445_v62 }
 0x23e   :  { %v1115_v2 = vpop.f32.mrf.mxu1 }
 0x23f   :  { %964 = vst [vmem:[#allocation8 + $0x80] sm:$0xff] %v886_v22  ;;  %v1116_v3 = vadd.f32 %v1115_v2, %v1114_v1 }
 0x240   :  { %v1117_v4 = vpop.f32.mrf.mxu1 }
 0x241   :  { %v889_v5 = vadd.f32 %v1116_v3, %v1445_v62 }
 0x242   :  { %v1118_v6 = vpop.f32.mrf.mxu1 }
 0x243   :  { %965 = vst [vmem:[#allocation8 + $0x88] sm:$0xff] %v889_v5  ;;  %v1119_v7 = vadd.f32 %v1118_v6, %v1117_v4 }
 0x244   :  { %v1120_v8 = vpop.f32.mrf.mxu1 }
 0x245   :  { %v894_v9 = vadd.f32 %v1119_v7, %v1445_v62 }
 0x246   :  { %v1121_v10 = vpop.f32.mrf.mxu1 }
 0x247   :  { %966 = vst [vmem:[#allocation8 + $0x90] sm:$0xff] %v894_v9  ;;  %v1122_v11 = vadd.f32 %v1121_v10, %v1120_v8 }
 0x248   :  { %v1123_v12 = vpop.f32.mrf.mxu1 }
 0x249   :  { %v897_v13 = vadd.f32 %v1122_v11, %v1445_v62 }
 0x24a   :  { %v1124_v14 = vpop.f32.mrf.mxu1 }
 0x24b   :  { %967 = vst [vmem:[#allocation8 + $0x98] sm:$0xff] %v897_v13  ;;  %v1125_v15 = vadd.f32 %v1124_v14, %v1123_v12 }
 0x24c   :  { %v1126_v16 = vpop.f32.mrf.mxu1 }
 0x24d   :  { %v902_v17 = vadd.f32 %v1125_v15, %v1445_v62 }
 0x24e   :  { %v1127_v18 = vpop.f32.mrf.mxu1 }
 0x24f   :  { %968 = vst [vmem:[#allocation8 + $0xa0] sm:$0xff] %v902_v17  ;;  %v1128_v19 = vadd.f32 %v1127_v18, %v1126_v16 }
 0x250   :  { %v1129_v20 = vpop.f32.mrf.mxu1 }
 0x251   :  { %v905_v21 = vadd.f32 %v1128_v19, %v1445_v62 }
 0x252   :  { %v1130_v24 = vpop.f32.mrf.mxu1 }
 0x253   :  { %969 = vst [vmem:[#allocation8 + $0xa8] sm:$0xff] %v905_v21  ;;  %v1131_v25 = vadd.f32 %v1130_v24, %v1129_v20 }
 0x254   :  { %v1132_v26 = vpop.f32.mrf.mxu1 }
 0x255   :  { %v910_v27 = vadd.f32 %v1131_v25, %v1445_v62 }
 0x256   :  { %v1133_v28 = vpop.f32.mrf.mxu1 }
 0x257   :  { %970 = vst [vmem:[#allocation8 + $0xb0] sm:$0xff] %v910_v27  ;;  %v1134_v29 = vadd.f32 %v1133_v28, %v1132_v26 }
 0x258   :  { %v1135_v30 = vpop.f32.mrf.mxu1 }
 0x259   :  { %v913_v31 = vadd.f32 %v1134_v29, %v1445_v62 }
 0x25a   :  { %v1136_v32 = vpop.f32.mrf.mxu1 }
 0x25b   :  { %971 = vst [vmem:[#allocation8 + $0xb8] sm:$0xff] %v913_v31  ;;  %v1137_v33 = vadd.f32 %v1136_v32, %v1135_v30 }
 0x25c   :  { %v1138_v34 = vpop.f32.mrf.mxu1 }
 0x25d   :  { %v918_v35 = vadd.f32 %v1137_v33, %v1445_v62 }
 0x25e   :  { %v1139_v36 = vpop.f32.mrf.mxu1 }
 0x25f   :  { %972 = vst [vmem:[#allocation8 + $0xc0] sm:$0xff] %v918_v35  ;;  %v1140_v37 = vadd.f32 %v1139_v36, %v1138_v34 }
 0x260   :  { %v1141_v38 = vpop.f32.mrf.mxu1 }
 0x261   :  { %v921_v39 = vadd.f32 %v1140_v37, %v1445_v62 }
 0x262   :  { %v1142_v40 = vpop.f32.mrf.mxu1 }
 0x263   :  { %973 = vst [vmem:[#allocation8 + $0xc8] sm:$0xff] %v921_v39  ;;  %v1143_v41 = vadd.f32 %v1142_v40, %v1141_v38 }
 0x264   :  { %v1144_v42 = vpop.f32.mrf.mxu1 }
 0x265   :  { %v926_v43 = vadd.f32 %v1143_v41, %v1445_v62 }
 0x266   :  { %v1145_v44 = vpop.f32.mrf.mxu1 }
 0x267   :  { %974 = vst [vmem:[#allocation8 + $0xd0] sm:$0xff] %v926_v43  ;;  %v1146_v45 = vadd.f32 %v1145_v44, %v1144_v42 }
 0x268   :  { %v1147_v46 = vpop.f32.mrf.mxu1 }
 0x269   :  { %v929_v47 = vadd.f32 %v1146_v45, %v1445_v62 }
 0x26a   :  { %v1148_v48 = vpop.f32.mrf.mxu1 }
 0x26b   :  { %975 = vst [vmem:[#allocation8 + $0xd8] sm:$0xff] %v929_v47  ;;  %v1149_v49 = vadd.f32 %v1148_v48, %v1147_v46 }
 0x26c   :  { %v1150_v50 = vpop.f32.mrf.mxu1 }
 0x26d   :  { %v934_v51 = vadd.f32 %v1149_v49, %v1445_v62 }
 0x26e   :  { %v1151_v52 = vpop.f32.mrf.mxu1 }
 0x26f   :  { %976 = vst [vmem:[#allocation8 + $0xe0] sm:$0xff] %v934_v51  ;;  %v1152_v53 = vadd.f32 %v1151_v52, %v1150_v50 }
 0x270   :  { %v1153_v54 = vpop.f32.mrf.mxu1 }
 0x271   :  { %v937_v55 = vadd.f32 %v1152_v53, %v1445_v62 }
 0x272   :  { %v1154_v56 = vpop.f32.mrf.mxu1 }
 0x273   :  { %977 = vst [vmem:[#allocation8 + $0xe8] sm:$0xff] %v937_v55  ;;  %v1155_v57 = vadd.f32 %v1154_v56, %v1153_v54 }
 0x274   :  { %v1156_v58 = vpop.f32.mrf.mxu1 }
 0x275   :  { %v942_v59 = vadd.f32 %v1155_v57, %v1445_v62 }
 0x276   :  { %v1157_v60 = vpop.f32.mrf.mxu1 }
 0x277   :  { %978 = vst [vmem:[#allocation8 + $0xf0] sm:$0xff] %v942_v59  ;;  %v1158_v61 = vadd.f32 %v1157_v60, %v1156_v58 }
 0x279   :  { %v945_v63 = vadd.f32 %v1158_v61, %v1445_v62 }
 0x27b   :  { %979 = vst [vmem:[#allocation8 + $0xf8] sm:$0xff] %v945_v63 }
 0x27c   :  { %1304 = shalt.err (!%p1301_p5)
}
 0x27d   :  { %991 = dma.vmem_to_hbm [thread:$0]  %s986_s14, 4096, %s1490_s5, [#allocation4], %s1320_s21, %s1320_s21, %s1321_s22  }
 0x27e   :  { %1317 = dma.done.wait [#allocation4], 4096  }
 0x27f   :  { %1318 = vsyncadd [#allocation4], 4294963200 }
 0x280   :  { %995 = vsyncpa [#allocation3], 1 }
 0x281   :  { %996 = vsyncpa [#allocation6], 1 }
 0x282   :  { %997 = vsyncpa [#allocation4], 1 }

</bundles_post_ra>
